<compile_context>
chip_gen: v7x
topology: tpu7x:2x2x1
jax: 0.10.0
libtpu: 0.0.40
codegen_flags: <defaults>
</compile_context>

<pallas_src>
import math
import functools

import jax
import jax.numpy as jnp
from jax.experimental import pallas as pl
from jax.experimental.pallas import tpu as pltpu


def _tuned_defaults():
    """(block_rows, vmem_limit_bytes) per TPU generation; safe fallback."""
    try:
        info = pltpu.get_tpu_info()
        vmem = getattr(info, "vmem_capacity_bytes", None)
        if vmem is not None and vmem <= 64 * 1024 * 1024:
            # v7x: 64 MiB VMEM per TensorCore -> 4 MiB f32 tiles (16 MiB
            # double-buffered in+out), keep vmem limit modest.
            return 1024, 40 * 1024 * 1024
        # v5e / v6e: 128 MiB VMEM -> 8 MiB f32 tiles (32 MiB buffered).
        # NOTE: this intentionally raises the v5e 16 MiB scoped default.
        return 2048, 64 * 1024 * 1024
    except Exception:
        return 1024, 48 * 1024 * 1024


_DEFAULT_BLOCK_ROWS, _DEFAULT_VMEM_LIMIT = _tuned_defaults()


def _gelu_kernel(x_ref, o_ref, *, approximate: bool):
    x = x_ref[...].astype(jnp.float32)
    if approximate:
        # 0.5*x*(1 + tanh(sqrt(2/pi)*(x + 0.044715*x^3)))
        # constant folded: inner = x*(c + c*0.044715*x*x); tanh goes to EUP.
        c = math.sqrt(2.0 / math.pi)
        ck = c * 0.044715
        inner = x * (c + ck * x * x)
        y = 0.5 * x * (1.0 + jnp.tanh(inner))
    else:
        # exact: 0.5*x*(1 + erf(x/sqrt(2)))
        # TODO(synk): on v7x the erf polynomial is VALU-bound; prefer
        # approximate=True there when the model allows.
        y = 0.5 * x * (1.0 + jax.lax.erf(x * (1.0 / math.sqrt(2.0))))
    o_ref[...] = y.astype(o_ref.dtype)


def _my_gelu_impl(x, approximate, block_rows, lane_width, vmem_limit_bytes):
    orig_shape = x.shape
    orig_dtype = x.dtype
    total = int(math.prod(orig_shape)) if orig_shape else 1
    if total == 0:
        return x

    itemsize = jnp.dtype(orig_dtype).itemsize
    # Native sublane multiple per dtype width (8 f32 / 16 bf16 / 32 int8).
    sublane = max(8, 32 // itemsize)

    flat = x.reshape(-1)

    # --- choose lane width C: prefer a multiple of 128 that divides `total`
    # exactly (no pad / no slice fast path), as wide as possible up to
    # lane_width so output stores are unmasked and lane-dense.
    C = None
    cand_hi = min(lane_width, (total // 128) * 128)
    for cand in range(cand_hi, 127, -128):
        if total % cand == 0:
            C = cand
            break

    if C is not None:
        padded_total = total
    else:
        # Fallback: pad only up to a multiple of C (NOT of bm*C); the last
        # grid step may still be a partial row block.
        C = min(lane_width, 128 * pl.cdiv(total, 128))
        padded_total = C * pl.cdiv(total, C)
        flat = jnp.pad(flat, (0, padded_total - total))

    rows = padded_total // C
    x2 = flat.reshape(rows, C)

    # --- choose row tile bm.
    if rows <= block_rows:
        if total * itemsize > (2 << 20) and rows >= 2 * sublane:
            # Mid-size input: force >= 2 grid steps so both v7x TensorCores
            # (parallel grid axis) get work.
            bm = sublane * pl.cdiv(pl.cdiv(rows, 2), sublane)
        else:
            bm = rows  # block == full array dim: any value is legal
    else:
        bm = block_rows  # multiple of sublane by construction

    grid = (pl.cdiv(rows, bm),)

    out = pl.pallas_call(
        functools.partial(_gelu_kernel, approximate=approximate),
        out_shape=jax.ShapeDtypeStruct((rows, C), orig_dtype),
        grid=grid,
        in_specs=[pl.BlockSpec((bm, C), lambda i: (i, 0))],
        out_specs=pl.BlockSpec((bm, C), lambda i: (i, 0)),
        compiler_params=pltpu.CompilerParams(
            dimension_semantics=("parallel",),
            vmem_limit_bytes=vmem_limit_bytes,
        ),
    )(x2)

    if padded_total == total:
        return out.reshape(orig_shape)
    return out.reshape(-1)[:total].reshape(orig_shape)


@functools.partial(
    jax.jit,
    static_argnames=("approximate", "block_rows", "lane_width", "vmem_limit_bytes"),
)
def my_gelu(
    x,
    approximate: bool = True,
    block_rows: int = _DEFAULT_BLOCK_ROWS,
    lane_width: int = 1024,
    vmem_limit_bytes: int = _DEFAULT_VMEM_LIMIT,
):
    """Pallas TPU GELU matching MyGELU.forward (elementwise, tanh or erf)."""
    return _my_gelu_impl(x, approximate, block_rows, lane_width, vmem_limit_bytes)


if __name__ == "__main__":
    key = jax.random.PRNGKey(0)
    # Small activation-shaped input (NCHW feature map).
    x = jax.random.normal(key, (2, 4, 16, 16), dtype=jnp.float32)

    # approximate=True (module default) — hits the no-pad fast path (2048 elems).
    y_approx = my_gelu(x, approximate=True)
    jax.block_until_ready(y_approx)

    # exact erf variant.
    y_exact = my_gelu(x, approximate=False)
    jax.block_until_ready(y_exact)

    # Reference check against plain-JAX formulas.
    xf = x.astype(jnp.float32)
    ref_approx = 0.5 * xf * (
        1.0 + jnp.tanh(math.sqrt(2.0 / math.pi) * (xf + 0.044715 * xf ** 3))
    )
    ref_exact = 0.5 * xf * (1.0 + jax.lax.erf(xf / math.sqrt(2.0)))
    assert y_approx.shape == x.shape and y_exact.shape == x.shape
    assert jnp.allclose(y_approx, ref_approx, atol=1e-5, rtol=1e-5)
    assert jnp.allclose(y_exact, ref_exact, atol=1e-5, rtol=1e-5)

    # Larger, non-divisible shape exercises the pad fallback + partial block.
    x_big = jax.random.normal(jax.random.PRNGKey(1), (3, 5, 37, 129), dtype=jnp.float32)
    y_big = my_gelu(x_big, approximate=True)
    jax.block_until_ready(y_big)
    xb = x_big.astype(jnp.float32)
    ref_big = 0.5 * xb * (
        1.0 + jnp.tanh(math.sqrt(2.0 / math.pi) * (xb + 0.044715 * xb ** 3))
    )
    assert jnp.allclose(y_big, ref_big, atol=1e-5, rtol=1e-5)

    print("KERNEL_OK")
</pallas_src>

<mosaic_0001>
module attributes {stable_mosaic.version = 11 : i64} {
  func.func @_gelu_kernel(%arg0: i32, %arg1: memref<2x1024xf32, #tpu.memory_space<vmem>>, %arg2: memref<2x1024xf32, #tpu.memory_space<vmem>>) attributes {dimension_semantics = [#tpu.dimension_semantics<parallel>], iteration_bounds = array<i64: 1>, scalar_prefetch = 0 : i64, scratch_operands = 0 : i64, tpu.core_type = #tpu.core_type<tc>, window_params = [{transform_indices = @transform_0, window_bounds = array<i64: 2, 1024>}, {transform_indices = @transform_1, window_bounds = array<i64: 2, 1024>}]} {
    %c0 = arith.constant 0 : index
    %c0_0 = arith.constant 0 : index
    %0 = vector.load %arg1[%c0, %c0_0] : memref<2x1024xf32, #tpu.memory_space<vmem>>, vector<2x1024xf32>
    %cst = arith.constant 0.0356774069 : f32
    %1 = vector.broadcast %cst : f32 to vector<2x1024xf32>
    %2 = arith.mulf %1, %0 : vector<2x1024xf32>
    %3 = arith.mulf %2, %0 : vector<2x1024xf32>
    %cst_1 = arith.constant 0.797884583 : f32
    %4 = vector.broadcast %cst_1 : f32 to vector<2x1024xf32>
    %5 = arith.addf %4, %3 : vector<2x1024xf32>
    %6 = arith.mulf %0, %5 : vector<2x1024xf32>
    %cst_2 = arith.constant 5.000000e-01 : f32
    %7 = vector.broadcast %cst_2 : f32 to vector<2x1024xf32>
    %8 = arith.mulf %7, %0 : vector<2x1024xf32>
    %9 = math.tanh %6 : vector<2x1024xf32>
    %cst_3 = arith.constant 1.000000e+00 : f32
    %10 = vector.broadcast %cst_3 : f32 to vector<2x1024xf32>
    %11 = arith.addf %10, %9 : vector<2x1024xf32>
    %12 = arith.mulf %8, %11 : vector<2x1024xf32>
    %c0_4 = arith.constant 0 : index
    %c0_5 = arith.constant 0 : index
    %13 = vector.load %arg2[%c0_4, %c0_5] : memref<2x1024xf32, #tpu.memory_space<vmem>>, vector<2x1024xf32>
    tpu.vector_store %arg2[%c0_4, %c0_5], %12 {strides = array<i32>} : memref<2x1024xf32, #tpu.memory_space<vmem>>, vector<2x1024xf32>,
    return
  }
  func.func @transform_0(%arg0: i32) -> (i32, i32) {
    %c0_i32 = arith.constant 0 : i32
    %c0_i32_0 = arith.constant 0 : i32
    return %arg0, %c0_i32 : i32, i32
  }
  func.func @transform_1(%arg0: i32) -> (i32, i32) {
    %c0_i32 = arith.constant 0 : i32
    %c0_i32_0 = arith.constant 0 : i32
    return %arg0, %c0_i32 : i32, i32
  }
}

</mosaic_0001>

<bundles_post_ra>
// kernel: my_gelu.1
= control target key start
LH: loop header
LB: loop body
LE: loop exit
PB: predicated region body
PF: predicated region fallthrough
CT: control target
= control target key end

     0   :  { %s58_s0 = inlined_call_operand.vmem [shape: f32[2,1024], index: 0, kind: input, shape index: {}]   ;;  %s59_s1 = inlined_call_operand.vmem [shape: f32[2,1024], index: 1, kind: output, shape index: {}]  }
   0x1   :  { %v8_v0 = vld [vmem:[%s58_s0] sm:$0xff]  ;;  %v9_v1 = vld [vmem:[%s58_s0 + $0x8] sm:$0xff] }
   0x2   :  { %v10_v2 = vmul.f32 0.035677407, %v8_v0  ;;  %v11_v3 = vmul.f32 0.035677407, %v9_v1  ;;  %v18_v10 = vmul.f32 0.5, %v8_v0  ;;  %v19_v12 = vmul.f32 0.5, %v9_v1 }
   0x4   :  { %v12_v4 = vmul.f32 %v10_v2, %v8_v0  ;;  %v13_v5 = vmul.f32 %v11_v3, %v9_v1 }
   0x6   :  { %v14_v6 = vadd.f32 0.7978846, %v12_v4  ;;  %v15_v7 = vadd.f32 0.7978846, %v13_v5 }
   0x8   :  { %v16_v8 = vmul.f32 %v14_v6, %v8_v0  ;;  %v17_v9 = vmul.f32 %v15_v7, %v9_v1 }
   0xa   :  { %32 = vtanh.f32 %v16_v8 }
   0xb   :  { %34 = vtanh.f32 %v17_v9 }
  0x14   :  { %v33_v11 = vpop.eup %32 }
  0x15   :  { %v35_v13 = vpop.eup %34  ;;  %v22_v14 = vadd.f32 1.0, %v33_v11 }
  0x16   :  { %v23_v15 = vadd.f32 1.0, %v35_v13 }
  0x17   :  { %v24_v16 = vmul.f32 %v22_v14, %v18_v10 }
  0x18   :  { %v25_v17 = vmul.f32 %v23_v15, %v19_v12 }
  0x19   :  { %26 = vst [vmem:[%s59_s1] sm:$0xff] %v24_v16 }
  0x1a   :  { %27 = vst [vmem:[%s59_s1 + $0x8] sm:$0xff] %v25_v17 }

</bundles_post_ra>
